<compile_context>
chip_gen: v6e
topology: v6e:2x2x1
jax: 0.10.0
libtpu: 0.0.40
codegen_flags: <defaults>
</compile_context>

<pallas_src>
import jax
import jax.numpy as jnp
from jax.experimental import pallas as pl
from jax.experimental.pallas import tpu as pltpu


def _oldnet_kernel(x_ref, w1_ref, b1_ref, w2_ref, b2_ref, w3_ref,
                   alpha_ref, b3_ref, o_ref):
    x = x_ref[...]                                                   # (TB, 50) bf16

    # fc1 + ReLU  (bf16 MXU, f32 accumulate; bias/ReLU in f32)
    a1 = jnp.dot(x, w1_ref[...], preferred_element_type=jnp.float32) + b1_ref[...]
    h1 = jnp.maximum(a1, 0.0)

    # Dropout(p=0.2): identity in inference mode.
    # TODO(synk): training-mode dropout (random mask + 1/(1-p) scaling) not implemented.

    # fc2 + PReLU (single shared alpha, scalar from SMEM)
    a2 = jnp.dot(h1.astype(jnp.bfloat16), w2_ref[...],
                 preferred_element_type=jnp.float32) + b2_ref[...]
    alpha = alpha_ref[0]
    h2 = jnp.where(a2 > 0.0, a2, alpha * a2)

    # out (100 -> 1) + Sigmoid: VPU multiply + lane reduction instead of an
    # N=1 MXU matmul; store as a lane-dense (1, TB) row.
    a3 = jnp.sum(h2 * w3_ref[...], axis=-1) + b3_ref[0]              # (TB,)
    o_ref[0, :] = jax.nn.sigmoid(a3)


def oldnet_forward(x, params, *, batch_tile=4096):
    """x: (B, 50) float32. params: dict from init_params ((in,out)-layout weights)."""
    B = x.shape[0]

    # Batch tile: multiple of 128 (lane-dense output), capped at `batch_tile`.
    TB = min(batch_tile, ((B + 127) // 128) * 128)
    G = pl.cdiv(B, TB)
    B_pad = G * TB
    if B_pad != B:
        x = jnp.pad(x, ((0, B_pad - B), (0, 0)))

    # bf16 inputs/weights for the MXU path; biases / final-layer math stay f32.
    x_bf = x.astype(jnp.bfloat16)
    w1 = params["w1"].astype(jnp.bfloat16)                    # (50, 50)
    w2 = params["w2"].astype(jnp.bfloat16)                    # (50, 100)
    b1 = params["b1"].astype(jnp.float32)                     # (1, 50)
    b2 = params["b2"].astype(jnp.float32)                     # (1, 100)
    w3 = params["w3"].astype(jnp.float32).reshape(1, 100)     # row vector
    b3 = params["b3"].astype(jnp.float32).reshape(1)          # scalar -> SMEM
    alpha = params["alpha"].astype(jnp.float32).reshape(1)    # scalar -> SMEM

    flops = 2 * B_pad * (50 * 50 + 50 * 100 + 100)
    bytes_accessed = (B_pad * 50 * 2 + B_pad * 4              # x in (bf16), y out (f32)
                      + (50 * 50 + 50 * 100) * 2              # bf16 weights
                      + (50 + 100 + 100 + 2) * 4)             # f32 biases / w3 / scalars

    out = pl.pallas_call(
        _oldnet_kernel,
        out_shape=jax.ShapeDtypeStruct((1, B_pad), jnp.float32),
        grid=(G,),
        in_specs=[
            pl.BlockSpec((TB, 50), lambda i: (i, 0)),            # x tile (streamed)
            pl.BlockSpec((50, 50), lambda i: (0, 0)),            # w1 (resident)
            pl.BlockSpec((1, 50), lambda i: (0, 0)),             # b1
            pl.BlockSpec((50, 100), lambda i: (0, 0)),           # w2
            pl.BlockSpec((1, 100), lambda i: (0, 0)),            # b2
            pl.BlockSpec((1, 100), lambda i: (0, 0)),            # w3 row
            pl.BlockSpec(memory_space=pltpu.MemorySpace.SMEM),   # alpha
            pl.BlockSpec(memory_space=pltpu.MemorySpace.SMEM),   # b3
        ],
        out_specs=pl.BlockSpec((1, TB), lambda i: (0, i)),       # lane-dense slab
        compiler_params=pltpu.CompilerParams(
            dimension_semantics=("parallel",),
            vmem_limit_bytes=32 * 1024 * 1024,
        ),
        cost_estimate=pl.CostEstimate(
            flops=flops, transcendentals=B_pad, bytes_accessed=bytes_accessed),
    )(x_bf, w1, b1, w2, b2, w3, alpha, b3)

    return out[0, :B].reshape(B, 1)


def init_params(key):
    """Deterministic parameter init (shapes match nn.Linear/PReLU of OldNet).

    PyTorch Linear weight is (out, in); we store the transpose (in, out).
    PReLU(1) default init is 0.25.
    """
    k1, k2, k3, k4, k5, k6 = jax.random.split(key, 6)

    def lin(kw, kb, fan_in, fan_out):
        bound = 1.0 / jnp.sqrt(fan_in)
        w = jax.random.uniform(kw, (fan_in, fan_out), jnp.float32, -bound, bound)
        b = jax.random.uniform(kb, (1, fan_out), jnp.float32, -bound, bound)
        return w, b

    w1, b1 = lin(k1, k2, 50, 50)
    w2, b2 = lin(k3, k4, 50, 100)
    w3, b3 = lin(k5, k6, 100, 1)
    alpha = jnp.full((1, 1), 0.25, jnp.float32)
    return {"w1": w1, "b1": b1, "w2": w2, "b2": b2,
            "w3": w3, "b3": b3, "alpha": alpha}


def reference_forward(x, p):
    a1 = x @ p["w1"] + p["b1"]
    h1 = jnp.maximum(a1, 0.0)
    a2 = h1 @ p["w2"] + p["b2"]
    h2 = jnp.where(a2 > 0, a2, p["alpha"] * a2)
    a3 = h2 @ p["w3"] + p["b3"]
    return jax.nn.sigmoid(a3)


if __name__ == "__main__":
    key = jax.random.PRNGKey(0)
    kx, kp = jax.random.split(key)

    B = 8
    x = jax.random.normal(kx, (B, 50), jnp.float32)
    params = init_params(kp)

    y = oldnet_forward(x, params)
    y = jax.block_until_ready(y)

    y_ref = reference_forward(x, params)
    assert y.shape == (B, 1)
    # bf16 matmul inputs -> small drift vs the f32 reference.
    assert jnp.allclose(y, y_ref, atol=1e-2, rtol=1e-2), "mismatch vs JAX reference"

    print("KERNEL_OK")
</pallas_src>

<mosaic_0001>
module attributes {stable_mosaic.version = 11 : i64} {
  func.func @_oldnet_kernel(%arg0: i32, %arg1: memref<128x50xbf16, #tpu.memory_space<vmem>>, %arg2: memref<50x50xbf16, #tpu.memory_space<vmem>>, %arg3: memref<1x50xf32, #tpu.memory_space<vmem>>, %arg4: memref<50x100xbf16, #tpu.memory_space<vmem>>, %arg5: memref<1x100xf32, #tpu.memory_space<vmem>>, %arg6: memref<1x100xf32, #tpu.memory_space<vmem>>, %arg7: memref<1xf32, #tpu.memory_space<smem>>, %arg8: memref<1xf32, #tpu.memory_space<smem>>, %arg9: memref<1x128xf32, #tpu.memory_space<vmem>>) attributes {dimension_semantics = [#tpu.dimension_semantics<parallel>], iteration_bounds = array<i64: 1>, scalar_prefetch = 0 : i64, scratch_operands = 0 : i64, tpu.core_type = #tpu.core_type<tc>, window_params = [{transform_indices = @transform_0, window_bounds = array<i64: 128, 50>}, {pipeline_mode = #tpu.pipeline_mode<synchronous>, transform_indices = @transform_1, window_bounds = array<i64: 50, 50>}, {pipeline_mode = #tpu.pipeline_mode<synchronous>, transform_indices = @transform_2, window_bounds = array<i64: 1, 50>}, {pipeline_mode = #tpu.pipeline_mode<synchronous>, transform_indices = @transform_3, window_bounds = array<i64: 50, 100>}, {pipeline_mode = #tpu.pipeline_mode<synchronous>, transform_indices = @transform_4, window_bounds = array<i64: 1, 100>}, {pipeline_mode = #tpu.pipeline_mode<synchronous>, transform_indices = @transform_5, window_bounds = array<i64: 1, 100>}, {transform_indices = @transform_6, window_bounds = array<i64: 1>}, {transform_indices = @transform_7, window_bounds = array<i64: 1>}, {transform_indices = @transform_8, window_bounds = array<i64: 1, 128>}]} {
    %c0 = arith.constant 0 : index
    %c0_0 = arith.constant 0 : index
    %0 = vector.load %arg1[%c0, %c0_0] : memref<128x50xbf16, #tpu.memory_space<vmem>>, vector<128x50xbf16>
    %c0_1 = arith.constant 0 : index
    %c0_2 = arith.constant 0 : index
    %1 = vector.load %arg2[%c0_1, %c0_2] : memref<50x50xbf16, #tpu.memory_space<vmem>>, vector<50x50xbf16>
    %cst = arith.constant dense<0.000000e+00> : vector<128x50xf32>
    %2 = tpu.matmul %0, %1, %cst {dimension_numbers = #tpu.dot_dimension_numbers<[1], [0], [0], [1], [0, 0, 1, 1], [], []>} : vector<128x50xbf16>, vector<50x50xbf16>, vector<128x50xf32> -> vector<128x50xf32>
    %c0_3 = arith.constant 0 : index
    %c0_4 = arith.constant 0 : index
    %3 = vector.load %arg3[%c0_3, %c0_4] : memref<1x50xf32, #tpu.memory_space<vmem>>, vector<1x50xf32>
    %4 = vector.broadcast %3 : vector<1x50xf32> to vector<128x50xf32>
    %5 = arith.addf %2, %4 : vector<128x50xf32>
    %cst_5 = arith.constant 0.000000e+00 : f32
    %6 = vector.broadcast %cst_5 : f32 to vector<128x50xf32>
    %7 = arith.maximumf %5, %6 : vector<128x50xf32>
    %8 = arith.truncf %7 : vector<128x50xf32> to vector<128x50xbf16>
    %c0_6 = arith.constant 0 : index
    %c0_7 = arith.constant 0 : index
    %9 = vector.load %arg4[%c0_6, %c0_7] : memref<50x100xbf16, #tpu.memory_space<vmem>>, vector<50x100xbf16>
    %cst_8 = arith.constant dense<0.000000e+00> : vector<128x100xf32>
    %10 = tpu.matmul %8, %9, %cst_8 {dimension_numbers = #tpu.dot_dimension_numbers<[1], [0], [0], [1], [0, 0, 1, 1], [], []>} : vector<128x50xbf16>, vector<50x100xbf16>, vector<128x100xf32> -> vector<128x100xf32>
    %c0_9 = arith.constant 0 : index
    %c0_10 = arith.constant 0 : index
    %11 = vector.load %arg5[%c0_9, %c0_10] : memref<1x100xf32, #tpu.memory_space<vmem>>, vector<1x100xf32>
    %12 = vector.broadcast %11 : vector<1x100xf32> to vector<128x100xf32>
    %13 = arith.addf %10, %12 : vector<128x100xf32>
    %c0_11 = arith.constant 0 : index
    %14 = memref.load %arg7[%c0_11] : memref<1xf32, #tpu.memory_space<smem>>
    %cst_12 = arith.constant 0.000000e+00 : f32
    %15 = vector.broadcast %cst_12 : f32 to vector<128x100xf32>
    %16 = arith.cmpf ogt, %13, %15 : vector<128x100xf32>
    %17 = vector.broadcast %14 : f32 to vector<128x100xf32>
    %18 = arith.mulf %17, %13 : vector<128x100xf32>
    %19 = arith.select %16, %13, %18 : vector<128x100xi1>, vector<128x100xf32>
    %c0_13 = arith.constant 0 : index
    %c0_14 = arith.constant 0 : index
    %20 = vector.load %arg6[%c0_13, %c0_14] : memref<1x100xf32, #tpu.memory_space<vmem>>, vector<1x100xf32>
    %21 = vector.broadcast %20 : vector<1x100xf32> to vector<128x100xf32>
    %22 = arith.mulf %19, %21 : vector<128x100xf32>
    %cst_15 = arith.constant dense<0.000000e+00> : vector<128xf32>
    %23 = vector.multi_reduction <add>, %22, %cst_15 [1] : vector<128x100xf32> to vector<128xf32>
    %c0_16 = arith.constant 0 : index
    %24 = memref.load %arg8[%c0_16] : memref<1xf32, #tpu.memory_space<smem>>
    %25 = vector.broadcast %24 : f32 to vector<128xf32>
    %26 = arith.addf %23, %25 : vector<128xf32>
    %27 = arith.negf %26 : vector<128xf32>
    %28 = math.exp %27 : vector<128xf32>
    %cst_17 = arith.constant 1.000000e+00 : f32
    %29 = vector.broadcast %cst_17 : f32 to vector<128xf32>
    %30 = arith.addf %29, %28 : vector<128xf32>
    %31 = arith.divf %29, %30 : vector<128xf32>
    %c0_18 = arith.constant 0 : index
    %c0_19 = arith.constant 0 : index
    %32 = vector.load %arg9[%c0_18, %c0_19] : memref<1x128xf32, #tpu.memory_space<vmem>>, vector<1x128xf32>
    %33 = vector.shape_cast %32 : vector<1x128xf32> to vector<128xf32>
    %34 = vector.shape_cast %31 : vector<128xf32> to vector<1x128xf32>
    tpu.vector_store %arg9[%c0_18, %c0_19], %34 {strides = array<i32>} : memref<1x128xf32, #tpu.memory_space<vmem>>, vector<1x128xf32>,
    return
  }
  func.func @transform_0(%arg0: i32) -> (i32, i32) {
    %c0_i32 = arith.constant 0 : i32
    %c0_i32_0 = arith.constant 0 : i32
    return %arg0, %c0_i32 : i32, i32
  }
  func.func @transform_1(%arg0: i32) -> (i32, i32) {
    %c0_i32 = arith.constant 0 : i32
    %c0_i32_0 = arith.constant 0 : i32
    %c0_i32_1 = arith.constant 0 : i32
    return %c0_i32, %c0_i32_0 : i32, i32
  }
  func.func @transform_2(%arg0: i32) -> (i32, i32) {
    %c0_i32 = arith.constant 0 : i32
    %c0_i32_0 = arith.constant 0 : i32
    %c0_i32_1 = arith.constant 0 : i32
    return %c0_i32, %c0_i32_0 : i32, i32
  }
  func.func @transform_3(%arg0: i32) -> (i32, i32) {
    %c0_i32 = arith.constant 0 : i32
    %c0_i32_0 = arith.constant 0 : i32
    %c0_i32_1 = arith.constant 0 : i32
    return %c0_i32, %c0_i32_0 : i32, i32
  }
  func.func @transform_4(%arg0: i32) -> (i32, i32) {
    %c0_i32 = arith.constant 0 : i32
    %c0_i32_0 = arith.constant 0 : i32
    %c0_i32_1 = arith.constant 0 : i32
    return %c0_i32, %c0_i32_0 : i32, i32
  }
  func.func @transform_5(%arg0: i32) -> (i32, i32) {
    %c0_i32 = arith.constant 0 : i32
    %c0_i32_0 = arith.constant 0 : i32
    %c0_i32_1 = arith.constant 0 : i32
    return %c0_i32, %c0_i32_0 : i32, i32
  }
  func.func @transform_6(%arg0: i32) -> i32 {
    %c0_i32 = arith.constant 0 : i32
    %c0_i32_0 = arith.constant 0 : i32
    return %c0_i32 : i32
  }
  func.func @transform_7(%arg0: i32) -> i32 {
    %c0_i32 = arith.constant 0 : i32
    %c0_i32_0 = arith.constant 0 : i32
    return %c0_i32 : i32
  }
  func.func @transform_8(%arg0: i32) -> (i32, i32) {
    %c0_i32 = arith.constant 0 : i32
    %c0_i32_0 = arith.constant 0 : i32
    return %c0_i32, %arg0 : i32, i32
  }
}

</mosaic_0001>

<bundles_post_ra>
// kernel: tpu_custom_call.1
= control target key start
LH: loop header
LB: loop body
LE: loop exit
PB: predicated region body
PF: predicated region fallthrough
CT: control target
= control target key end

     0   :  { %vm149_vm0 = vcmask 1040384   ;;  %vm124_vm1 = vcmask 408576   ;;  %s1296_s0 = inlined_call_operand.vmem [shape: bf16[128,50], index: 0, kind: input, shape index: {}]   ;;  %s1297_s1 = inlined_call_operand.vmem [shape: bf16[50,50], index: 1, kind: input, shape index: {}]   ;;  %s1298_s2 = inlined_call_operand.vmem [shape: f32[1,50], index: 2, kind: input, shape index: {}]   ;;  %s1299_s3 = inlined_call_operand.vmem [shape: bf16[50,100], index: 3, kind: input, shape index: {}]   ;;  %s1300_s4 = inlined_call_operand.vmem [shape: f32[1,100], index: 4, kind: input, shape index: {}]   ;;  %s1301_s5 = inlined_call_operand.vmem [shape: f32[1,100], index: 5, kind: input, shape index: {}]   ;;  %s1302_s6 = inlined_call_operand.<no memory space> [shape: f32[1], index: 6, kind: input, shape index: {}]   ;;  %s1303_s7 = inlined_call_operand.<no memory space> [shape: f32[1], index: 7, kind: input, shape index: {}]   ;;  %s1304_s8 = inlined_call_operand.hbm [shape: f32[1,128], index: 8, kind: output, shape index: {}]  }
   0x1   :  { %v938_v0 = vld [vmem:[%s1297_s1 + $0x18] ss:$0 sps:$4 sm:$0x11]   ;;  %v939_v1 = vld [vmem:[%s1297_s1 + $0x10] sm:$0xff]   ;;  %v940_v3 = vld [vmem:[%s1297_s1 + $0x8] sm:$0xff]  }
   0x2   :  { %935 = vmatprep.subr.msk.bf16.mxu0 %vm149_vm0, %v938_v0  ;;  %v151_v2 = vsel %vm149_vm0, %v938_v0, 0  ;;  %v942_v4 = vld [vmem:[%s1296_s0] sm:$0xff]   ;;  %v950_v6 = vld [vmem:[%s1299_s3 + $0x18] ss:$0 sps:$4 sm:$0x11]   ;;  %v943_v7 = vld [vmem:[%s1296_s0 + $0x8] sm:$0xff]  }
   0x3   :  { %888 = vmatpush3.bf16.msra.mxu0 %v151_v2  ;;  %895 = vmatprep.mubr.msk.bf16.mxu0 %vm124_vm1, %v942_v4  ;;  %v941_v5 = vld [vmem:[%s1297_s1] sm:$0xff]   ;;  %v334_v8 = vsel %vm149_vm0, %v950_v6, 0  ;;  %v944_v9 = vld [vmem:[%s1296_s0 + $0x10] sm:$0xff]  }
   0x4   :  { %889 = vmatprep.subr.bf16.mxu0 %v939_v1  ;;  %936 = vmatprep.subr.msk.bf16.mxu1 %vm149_vm0, %v950_v6 }
   0x5   :  { %912 = vmatpush3.bf16.msra.mxu1 %v334_v8 }
   0x7   :  { %890 = vmatpush3.bf16.msra.mxu0 %v939_v1 }
   0x8   :  { %891 = vmatprep.subr.bf16.mxu0 %v940_v3 }
   0xb   :  { %892 = vmatpush3.bf16.msra.mxu0 %v940_v3 }
   0xc   :  { %893 = vmatprep.subr.bf16.mxu0 %v941_v5 }
   0xf   :  { %894 = vmatpush3.bf16.msra.mxu0 %v941_v5 }
  0x10   :  { %15 = vsyncpa [#allocation5], 0  ;;  %v945_v10 = vld [vmem:[%s1296_s0 + $0x18] sm:$0xff]   ;;  %v946_v11 = vld [vmem:[%s1296_s0 + $0x20] sm:$0xff]   ;;  %vm506_vm3 = vcmask 818176  }
  0x11   :  { %v947_v12 = vld [vmem:[%s1296_s0 + $0x28] sm:$0xff]   ;;  %v948_v13 = vld [vmem:[%s1296_s0 + $0x30] sm:$0xff]   ;;  %v949_v14 = vld [vmem:[%s1296_s0 + $0x38] sm:$0xff]  }
  0x12   :  { %896 = vmatmul.mubr.msk.bf16.vlgmr.msra.gmra.mxu0 %vm124_vm1, %v943_v7  ;;  %v951_v15 = vld [vmem:[%s1299_s3 + $0x10] sm:$0xff]   ;;  %v952_v16 = vld [vmem:[%s1299_s3 + $0x8] sm:$0xff]   ;;  %v953_v17 = vld [vmem:[%s1299_s3] sm:$0xff]  }
  0x13   :  { %899 = vmatprep.mubr.msk.bf16.mxu0 %vm124_vm1, %v944_v9  ;;  %913 = vmatprep.subr.bf16.mxu1 %v951_v15  ;;  %v812_v20 = vld [vmem:[%s1298_s2] ss:$0 sm:$0xff] }
  0x14   :  { %914 = vmatpush3.bf16.msra.mxu1 %v951_v15 }
  0x15   :  { %915 = vmatprep.subr.bf16.mxu1 %v952_v16 }
  0x18   :  { %916 = vmatpush3.bf16.msra.mxu1 %v952_v16 }
  0x19   :  { %917 = vmatprep.subr.bf16.mxu1 %v953_v17 }
  0x1a   :  { %900 = vmatmul.mubr.msk.bf16.gmra.mxu0 %vm124_vm1, %v945_v10 }
  0x1b   :  { %903 = vmatprep.mubr.msk.bf16.mxu0 %vm124_vm1, %v946_v11  ;;  %v1160_v11 = vld [vmem:[%s1300_s4] ss:$0 sm:$0xff] }
  0x1c   :  { %918 = vmatpush3.bf16.msra.mxu1 %v953_v17 }
  0x22   :  { %904 = vmatmul.mubr.msk.bf16.gmra.mxu0 %vm124_vm1, %v947_v12 }
  0x23   :  { %907 = vmatprep.mubr.msk.bf16.mxu0 %vm124_vm1, %v948_v13  ;;  %v1165_v13 = vstv %s1302_s6  ;;  %s1040_s6 = smov [#allocation4]  }
  0x2a   :  { %908 = vmatmul.mubr.msk.bf16.gmra.mxu0 %vm124_vm1, %v949_v14 }
  0xd2   :  { %v897_v18 = vpop.f32.mrf.mxu0 }
  0xd3   :  { %v196_v24 = vadd.f32 %v897_v18, %v812_v20  ;;  %v1173_v18 = vld [vmem:[%s1301_s5] ss:$0 sm:$0xff] }
  0xd4   :  { %v187_v19 = vpop.f32.mrf.mxu0 }
  0xd5   :  { %v188_v22 = vadd.f32 %v812_v20, %v187_v19  ;;  %v252_v31 = vmax.f32 %v196_v24, 0.0 }
  0xd6   :  { %v898_v21 = vpop.f32.mrf.mxu0 }
  0xd7   :  { %v199_v23 = vadd.f32 %v898_v21, %v812_v20  ;;  %v250_v29 = vmax.f32 %v188_v22, 0.0 }
  0xd8   :  { %v190_v25 = vpop.f32.mrf.mxu0 }
  0xd9   :  { %v191_v26 = vadd.f32 %v812_v20, %v190_v25  ;;  %v253_v27 = vmax.f32 %v199_v23, 0.0 }
  0xda   :  { %v901_v28 = vpop.f32.mrf.mxu0 }
  0xdb   :  { %v251_v30 = vmax.f32 %v191_v26, 0.0  ;;  %v267_v34 = vpack.c.bf16 %v253_v27, %v252_v31  ;;  %v212_v38 = vadd.f32 %v901_v28, %v812_v20 }
  0xdc   :  { %v203_v32 = vpop.f32.mrf.mxu0 }
  0xdd   :  { %v266_v33 = vpack.c.bf16 %v251_v30, %v250_v29  ;;  %v204_v36 = vadd.f32 %v812_v20, %v203_v32  ;;  %v256_v45 = vmax.f32 %v212_v38, 0.0 }
  0xde   :  { %v902_v35 = vpop.f32.mrf.mxu0 }
  0xdf   :  { %v215_v37 = vadd.f32 %v902_v35, %v812_v20  ;;  %919 = vmatprep.mubr.msk.bf16.mxu1 %vm124_vm1, %v266_v33  ;;  %v254_v43 = vmax.f32 %v204_v36, 0.0 }
  0xe0   :  { %v206_v39 = vpop.f32.mrf.mxu0  ;;  %920 = vmatmul.mubr.msk.bf16.vlgmr.msra.gmra.mxu1 %vm124_vm1, %v267_v34 }
  0xe1   :  { %v207_v40 = vadd.f32 %v812_v20, %v206_v39  ;;  %v257_v41 = vmax.f32 %v215_v37, 0.0 }
  0xe2   :  { %v905_v42 = vpop.f32.mrf.mxu0 }
  0xe3   :  { %v255_v44 = vmax.f32 %v207_v40, 0.0  ;;  %v269_v48 = vpack.c.bf16 %v257_v41, %v256_v45  ;;  %v228_v52 = vadd.f32 %v905_v42, %v812_v20 }
  0xe4   :  { %v219_v46 = vpop.f32.mrf.mxu0 }
  0xe5   :  { %v268_v47 = vpack.c.bf16 %v255_v44, %v254_v43  ;;  %v220_v50 = vadd.f32 %v812_v20, %v219_v46  ;;  %v260_v59 = vmax.f32 %v228_v52, 0.0 }
  0xe6   :  { %v906_v49 = vpop.f32.mrf.mxu0 }
  0xe7   :  { %v231_v51 = vadd.f32 %v906_v49, %v812_v20  ;;  %923 = vmatprep.mubr.msk.bf16.mxu1 %vm124_vm1, %v268_v47  ;;  %v258_v57 = vmax.f32 %v220_v50, 0.0 }
  0xe8   :  { %v222_v53 = vpop.f32.mrf.mxu0  ;;  %924 = vmatmul.mubr.msk.bf16.gmra.mxu1 %vm124_vm1, %v269_v48 }
  0xe9   :  { %v223_v54 = vadd.f32 %v812_v20, %v222_v53  ;;  %v261_v55 = vmax.f32 %v231_v51, 0.0 }
  0xea   :  { %v909_v56 = vpop.f32.mrf.mxu0 }
  0xeb   :  { %v259_v58 = vmax.f32 %v223_v54, 0.0  ;;  %v271_v62 = vpack.c.bf16 %v261_v55, %v260_v59  ;;  %v244_v2 = vadd.f32 %v909_v56, %v812_v20 }
  0xec   :  { %v235_v60 = vpop.f32.mrf.mxu0 }
  0xed   :  { %v270_v61 = vpack.c.bf16 %v259_v58, %v258_v57  ;;  %v236_v0 = vadd.f32 %v812_v20, %v235_v60  ;;  %v264_v8 = vmax.f32 %v244_v2, 0.0 }
  0xee   :  { %v910_v63 = vpop.f32.mrf.mxu0 }
  0xef   :  { %v247_v1 = vadd.f32 %v910_v63, %v812_v20  ;;  %927 = vmatprep.mubr.msk.bf16.mxu1 %vm124_vm1, %v270_v61  ;;  %v262_v6 = vmax.f32 %v236_v0, 0.0 }
  0xf0   :  { %v238_v3 = vpop.f32.mrf.mxu0  ;;  %928 = vmatmul.mubr.msk.bf16.gmra.mxu1 %vm124_vm1, %v271_v62 }
  0xf1   :  { %v239_v4 = vadd.f32 %v812_v20, %v238_v3  ;;  %v265_v5 = vmax.f32 %v247_v1, 0.0 }
  0xf3   :  { %v263_v7 = vmax.f32 %v239_v4, 0.0  ;;  %v273_v10 = vpack.c.bf16 %v265_v5, %v264_v8 }
  0xf5   :  { %v272_v9 = vpack.c.bf16 %v263_v7, %v262_v6 }
  0xf7   :  { %931 = vmatprep.mubr.msk.bf16.mxu1 %vm124_vm1, %v272_v9 }
  0xf8   :  { %932 = vmatmul.mubr.msk.bf16.gmra.mxu1 %vm124_vm1, %v273_v10 }
 0x1a0   :  { %v921_v12 = vpop.f32.mrf.mxu1 }
 0x1a1   :  { %v379_v14 = vadd.f32 %v921_v12, %v1160_v11 }
 0x1a2   :  { %v370_v15 = vpop.f32.mrf.mxu1 }
 0x1a3   :  { %v453_v16 = vmul.f32 %v1165_v13, %v379_v14  ;;  %v371_v17 = vadd.f32 %v1160_v11, %v370_v15  ;;  %vm436_vm2 = vcmp.gt.f32.partialorder %v379_v14, 0.0 }
 0x1a4   :  { %v922_v19 = vpop.f32.mrf.mxu1 }
 0x1a5   :  { %v451_v20 = vmul.f32 %v1165_v13, %v371_v17  ;;  %v382_v21 = vadd.f32 %v922_v19, %v1160_v11  ;;  %v469_v22 = vsel %vm436_vm2, %v379_v14, %v453_v16  ;;  %vm434_vm4 = vcmp.gt.f32.partialorder %v371_v17, 0.0 }
 0x1a6   :  { %v373_v23 = vpop.f32.mrf.mxu1  ;;  %v492_v24 = vmul.f32 %v1173_v18, %v469_v22 }
 0x1a7   :  { %vm437_vm5 = vcmp.gt.f32.partialorder %v382_v21, 0.0  ;;  %v454_v25 = vmul.f32 %v1165_v13, %v382_v21  ;;  %v374_v26 = vadd.f32 %v1160_v11, %v373_v23  ;;  %v467_v27 = vsel %vm434_vm4, %v371_v17, %v451_v20 }
 0x1a8   :  { %v925_v28 = vpop.f32.mrf.mxu1  ;;  %v513_v29 = vsel %vm506_vm3, %v492_v24, 0.0  ;;  %v490_v30 = vmul.f32 %v1173_v18, %v467_v27  ;;  %vm703_vm4 = vcmask 195712  }
 0x1a9   :  { %vm435_vm6 = vcmp.gt.f32.partialorder %v374_v26, 0.0  ;;  %v452_v31 = vmul.f32 %v1165_v13, %v374_v26  ;;  %v395_v32 = vadd.f32 %v925_v28, %v1160_v11  ;;  %514 = vadd.xlane.f32.xlu1 %v513_v29  ;;  %v470_v33 = vsel %vm437_vm5, %v382_v21, %v454_v25 }
 0x1aa   :  { %v386_v34 = vpop.f32.mrf.mxu1  ;;  %v507_v35 = vsel %vm506_vm3, %v490_v30, 0.0  ;;  %v493_v36 = vmul.f32 %v1173_v18, %v470_v33  ;;  %vm710_vm5 = vcmask 261312  }
 0x1ab   :  { %vm440_vm7 = vcmp.gt.f32.partialorder %v395_v32, 0.0  ;;  %v457_v37 = vmul.f32 %v1165_v13, %v395_v32  ;;  %v387_v38 = vadd.f32 %v1160_v11, %v386_v34  ;;  %508 = vadd.xlane.f32.xlu0 %v507_v35  ;;  %v468_v39 = vsel %vm435_vm6, %v374_v26, %v452_v31 }
 0x1ac   :  { %v926_v40 = vpop.f32.mrf.mxu1  ;;  %v516_v41 = vsel %vm506_vm3, %v493_v36, 0.0  ;;  %v491_v42 = vmul.f32 %v1173_v18, %v468_v39  ;;  %vm717_vm6 = vcmask 326912  }
 0x1ad   :  { %vm438_vm8 = vcmp.gt.f32.partialorder %v387_v38, 0.0  ;;  %v455_v43 = vmul.f32 %v1165_v13, %v387_v38  ;;  %v398_v44 = vadd.f32 %v926_v40, %v1160_v11  ;;  %517 = vadd.xlane.f32.xlu1 %v516_v41  ;;  %v473_v45 = vsel %vm440_vm7, %v395_v32, %v457_v37 }
 0x1ae   :  { %v389_v46 = vpop.f32.mrf.mxu1  ;;  %v510_v47 = vsel %vm506_vm3, %v491_v42, 0.0  ;;  %v496_v48 = vmul.f32 %v1173_v18, %v473_v45  ;;  %vm724_vm7 = vcmask 392512  }
 0x1af   :  { %vm441_vm9 = vcmp.gt.f32.partialorder %v398_v44, 0.0  ;;  %v458_v49 = vmul.f32 %v1165_v13, %v398_v44  ;;  %v390_v50 = vadd.f32 %v1160_v11, %v389_v46  ;;  %511 = vadd.xlane.f32.xlu0 %v510_v47  ;;  %v471_v51 = vsel %vm438_vm8, %v387_v38, %v455_v43 }
 0x1b0   :  { %v929_v52 = vpop.f32.mrf.mxu1  ;;  %v525_v57 = vsel %vm506_vm3, %v496_v48, 0.0  ;;  %v494_v59 = vmul.f32 %v1173_v18, %v471_v51  ;;  %v1239_v47 = vstv %s1303_s7  ;;  %vm731_vm8 = vcmask 458112   ;;  %s804_s7 = sshll.u32 %s1040_s6, 4  ;;  %s805_s7 = int_to_ptr.vmem [resolvable:$true] %s804_s7 }
 0x1b1   :  { %vm439_vm10 = vcmp.gt.f32.partialorder %v390_v50, 0.0  ;;  %v456_v53 = vmul.f32 %v1165_v13, %v390_v50  ;;  %v411_v54 = vadd.f32 %v929_v52, %v1160_v11  ;;  %v474_v55 = vsel %vm441_vm9, %v398_v44, %v458_v49  ;;  %s1018_s19 = scalar_lea.vmem %s805_s7, 16  ;;  %s1022_s20 = scalar_lea.vmem %s805_s7, 32 }
 0x1b2   :  { %v402_v56 = vpop.f32.mrf.mxu1  ;;  %v497_v58 = vmul.f32 %v1173_v18, %v474_v55  ;;  %v519_v6 = vsel %vm506_vm3, %v494_v59, 0.0  ;;  %vm738_vm9 = vcmask 523712   ;;  %p1019_p0 = scmp.ne.s32.totalorder %s805_s7, %s1018_s19  ;;  %p1023_p1 = scmp.lt.s32.totalorder %s805_s7, %s805_s7 }
 0x1b3   :  { %vm444_vm11 = vcmp.gt.f32.partialorder %v411_v54, 0.0  ;;  %v461_v60 = vmul.f32 %v1165_v13, %v411_v54  ;;  %v403_v61 = vadd.f32 %v1160_v11, %v402_v56  ;;  %526 = vadd.xlane.f32.xlu0 %v525_v57  ;;  %v472_v62 = vsel %vm439_vm10, %v390_v50, %v456_v53  ;;  %p1024_p2 = scmp.lt.s32.totalorder %s1022_s20, %s1018_s19 }
 0x1b4   :  { %v930_v63 = vpop.f32.mrf.mxu1  ;;  %v528_v0 = vsel %vm506_vm3, %v497_v58, 0.0  ;;  %v495_v1 = vmul.f32 %v1173_v18, %v472_v62  ;;  %vm745_vm10 = vcmask 589312  }
 0x1b5   :  { %vm442_vm12 = vcmp.gt.f32.partialorder %v403_v61, 0.0  ;;  %v459_v2 = vmul.f32 %v1165_v13, %v403_v61  ;;  %v414_v3 = vadd.f32 %v930_v63, %v1160_v11  ;;  %529 = vadd.xlane.f32.xlu1 %v528_v0  ;;  %v477_v4 = vsel %vm444_vm11, %v411_v54, %v461_v60  ;;  %p1025_p3 = por %p1024_p2, %p1023_p1 }
 0x1b6   :  { %v405_v5 = vpop.f32.mrf.mxu1  ;;  %v500_v7 = vmul.f32 %v1173_v18, %v477_v4  ;;  %v522_v14 = vsel %vm506_vm3, %v495_v1, 0.0  ;;  %vm752_vm11 = vcmask 654912  }
 0x1b7   :  { %vm445_vm13 = vcmp.gt.f32.partialorder %v414_v3, 0.0  ;;  %v462_v8 = vmul.f32 %v1165_v13, %v414_v3  ;;  %v406_v9 = vadd.f32 %v1160_v11, %v405_v5  ;;  %520 = vadd.xlane.f32.xlu0 %v519_v6  ;;  %v475_v10 = vsel %vm442_vm12, %v403_v61, %v459_v2  ;;  %p1026_p4 = pnand %p1025_p3, %p1019_p0 }
 0x1b8   :  { %v933_v12 = vpop.f32.mrf.mxu1  ;;  %v537_v20 = vsel %vm506_vm3, %v500_v7, 0.0  ;;  %v498_v22 = vmul.f32 %v1173_v18, %v475_v10  ;;  %vm759_vm12 = vcmask 720512  }
 0x1b9   :  { %vm443_vm14 = vcmp.gt.f32.partialorder %v406_v9, 0.0  ;;  %v460_v15 = vmul.f32 %v1165_v13, %v406_v9  ;;  %v427_v16 = vadd.f32 %v933_v12, %v1160_v11  ;;  %523 = vadd.xlane.f32.xlu1 %v522_v14  ;;  %v478_v17 = vsel %vm445_vm13, %v414_v3, %v462_v8 }
 0x1ba   :  { %v418_v19 = vpop.f32.mrf.mxu1  ;;  %v501_v21 = vmul.f32 %v1173_v18, %v478_v17  ;;  %v531_v32 = vsel %vm506_vm3, %v498_v22, 0.0  ;;  %vm766_vm13 = vcmask 786112  }
 0x1bb   :  { %v465_v23 = vmul.f32 %v1165_v13, %v427_v16  ;;  %v419_v24 = vadd.f32 %v1160_v11, %v418_v19  ;;  %538 = vadd.xlane.f32.xlu0 %v537_v20  ;;  %v476_v25 = vsel %vm443_vm14, %v406_v9, %v460_v15  ;;  %vm448_vm15 = vcmp.gt.f32.partialorder %v427_v16, 0.0 }
 0x1bc   :  { %v934_v26 = vpop.f32.mrf.mxu1  ;;  %v540_v27 = vsel %vm506_vm3, %v501_v21, 0.0  ;;  %v499_v28 = vmul.f32 %v1173_v18, %v476_v25  ;;  %vm773_vm14 = vcmask 851712  }
 0x1bd   :  { %vm446_vm0 = vcmp.gt.f32.partialorder %v419_v24, 0.0  ;;  %v463_v29 = vmul.f32 %v1165_v13, %v419_v24  ;;  %v430_v30 = vadd.f32 %v934_v26, %v1160_v11  ;;  %541 = vadd.xlane.f32.xlu1 %v540_v27  ;;  %v481_v36 = vsel %vm448_vm15, %v427_v16, %v465_v23 }
 0x1be   :  { %v421_v31 = vpop.f32.mrf.mxu1  ;;  %v534_v37 = vsel %vm506_vm3, %v499_v28, 0.0  ;;  %v504_v41 = vmul.f32 %v1173_v18, %v481_v36  ;;  %v685_v28 = vlaneseq  ;;  %vm780_vm15 = vcmask 917312  }
 0x1bf   :  { %v466_v33 = vmul.f32 %v1165_v13, %v430_v30  ;;  %v422_v34 = vadd.f32 %v1160_v11, %v421_v31  ;;  %532 = vadd.xlane.f32.xlu0 %v531_v32  ;;  %v479_v35 = vsel %vm446_vm0, %v419_v24, %v463_v29  ;;  %vm449_vm1 = vcmp.gt.f32.partialorder %v430_v30, 0.0 }
 0x1c0   :  { %v502_v38 = vmul.f32 %v1173_v18, %v479_v35  ;;  %v549_v45 = vsel %vm506_vm3, %v504_v41, 0.0  ;;  %vm787_vm0 = vcmask 982912  }
 0x1c1   :  { %vm447_vm2 = vcmp.gt.f32.partialorder %v422_v34, 0.0  ;;  %v464_v39 = vmul.f32 %v1165_v13, %v422_v34  ;;  %535 = vadd.xlane.f32.xlu1 %v534_v37  ;;  %v482_v43 = vsel %vm449_vm1, %v430_v30, %v466_v33  ;;  %vm794_vm1 = vcmask 1048512  }
 0x1c2   :  { %v543_v40 = vsel %vm506_vm3, %v502_v38, 0.0  ;;  %v505_v46 = vmul.f32 %v1173_v18, %v482_v43  ;;  %v1254_v38 = vand.u32 127, %v685_v28 }
 0x1c3   :  { %544 = vadd.xlane.f32.xlu0 %v543_v40  ;;  %v480_v42 = vsel %vm447_vm2, %v422_v34, %v464_v39 }
 0x1c4   :  { %v503_v11 = vmul.f32 %v1173_v18, %v480_v42  ;;  %v552_v13 = vsel %vm506_vm3, %v505_v46, 0.0  ;;  %v691_v42 = vadd.s32 4294967288, %v1254_v38 }
 0x1c6   :  { %v546_v44 = vsel %vm506_vm3, %v503_v11, 0.0  ;;  %vm696_vm3 = vcmask 130112  }
 0x1c7   :  { %547 = vadd.xlane.f32.xlu1 %v546_v44  ;;  %550 = vadd.xlane.f32.xlu0 %v549_v45 }
 0x1cb   :  { %553 = vadd.xlane.f32.xlu1 %v552_v13 }
 0x232   :  { %v515_v48 = vpop.xlane.xlu1 %514 }
 0x233   :  { %v559_v49 = vadd.f32 %v1239_v47, %v515_v48  ;;  %v1259_v48 = vshrl.u32 %v685_v28, 7 }
 0x234   :  { %v509_v50 = vpop.xlane.xlu0 %508 }
 0x235   :  { %v849_v51 = vmul.f32 -1.442695, %v559_v49  ;;  %v557_v52 = vadd.f32 %v1239_v47, %v509_v50 }
 0x236   :  { %v518_v53 = vpop.xlane.xlu1 %517 }
 0x237   :  { %954 = vpow2.f32 %v849_v51  ;;  %v847_v18 = vmul.f32 -1.442695, %v557_v52  ;;  %v560_v54 = vadd.f32 %v1239_v47, %v518_v53  ;;  %v698_v51 = vadd.s32 4294967280, %v1254_v38 }
 0x238   :  { %v512_v55 = vpop.xlane.xlu0 %511 }
 0x239   :  { %956 = vpow2.f32 %v847_v18  ;;  %v850_v56 = vmul.f32 -1.442695, %v560_v54  ;;  %v558_v57 = vadd.f32 %v1239_v47, %v512_v55  ;;  %v694_v18 = vsub.s32 %v691_v42, %v1259_v48 }
 0x23b   :  { %v848_v58 = vmul.f32 -1.442695, %v558_v57  ;;  %958 = vpow2.f32 %v850_v56  ;;  %v689_v57 = vsub.s32 %v1254_v38, %v1259_v48 }
 0x23c   :  { %v527_v59 = vpop.xlane.xlu0 %526 }
 0x23d   :  { %960 = vpow2.f32 %v848_v58  ;;  %v563_v60 = vadd.f32 %v1239_v47, %v527_v59  ;;  %v705_v59 = vadd.s32 4294967272, %v1254_v38 }
 0x23e   :  { %v530_v61 = vpop.xlane.xlu1 %529 }
 0x23f   :  { %v853_v62 = vmul.f32 -1.442695, %v563_v60  ;;  %v564_v63 = vadd.f32 %v1239_v47, %v530_v61  ;;  %v701_v61 = vsub.s32 %v698_v51, %v1259_v48 }
 0x240   :  { %v521_v0 = vpop.xlane.xlu0 %520 }
 0x241   :  { %962 = vpow2.f32 %v853_v62  ;;  %v561_v1 = vadd.f32 %v1239_v47, %v521_v0  ;;  %v854_v3 = vmul.f32 -1.442695, %v564_v63  ;;  %v712_v0 = vadd.s32 4294967264, %v1254_v38 }
 0x242   :  { %v524_v2 = vpop.xlane.xlu1 %523 }
 0x243   :  { %v851_v4 = vmul.f32 -1.442695, %v561_v1  ;;  %v562_v5 = vadd.f32 %v1239_v47, %v524_v2 }
 0x244   :  { %v955_v6 = vpop.eup %954  ;;  %v539_v7 = vpop.xlane.xlu0 %538 }
 0x245   :  { %v623_v8 = vadd.f32 1.0, %v955_v6  ;;  %964 = vpow2.f32 %v851_v4  ;;  %v852_v9 = vmul.f32 -1.442695, %v562_v5  ;;  %v567_v10 = vadd.f32 %v1239_v47, %v539_v7 }
 0x246   :  { %v957_v12 = vpop.eup %956  ;;  %v542_v14 = vpop.xlane.xlu1 %541  ;;  %966 = vpow2.f32 %v854_v3  ;;  %v708_v5 = vsub.s32 %v705_v59, %v1259_v48 }
 0x247   :  { %v621_v15 = vadd.f32 1.0, %v957_v12  ;;  %v857_v16 = vmul.f32 -1.442695, %v567_v10  ;;  %v568_v17 = vadd.f32 %v1239_v47, %v542_v14  ;;  %968 = vpow2.f32 %v852_v9 }
 0x248   :  { %v533_v19 = vpop.xlane.xlu0 %532  ;;  %v959_v20 = vpop.eup %958  ;;  %970 = vrcp.f32 %v623_v8  ;;  %v719_v9 = vadd.s32 4294967256, %v1254_v38  ;;  %v715_v14 = vsub.s32 %v712_v0, %v1259_v48  ;;  %v789_v0 = vadd.s32 4294967176, %v1254_v38 }
 0x249   :  { %v858_v21 = vmul.f32 -1.442695, %v568_v17  ;;  %v565_v22 = vadd.f32 %v1239_v47, %v533_v19  ;;  %972 = vpow2.f32 %v857_v16  ;;  %v624_v30 = vadd.f32 1.0, %v959_v20 }
 0x24a   :  { %v961_v23 = vpop.eup %960  ;;  %v536_v24 = vpop.xlane.xlu1 %535  ;;  %974 = vrcp.f32 %v621_v15  ;;  %v726_v15 = vadd.s32 4294967248, %v1254_v38  ;;  %v733_v20 = vadd.s32 4294967240, %v1254_v38 }
 0x24b   :  { %v622_v25 = vadd.f32 1.0, %v961_v23  ;;  %v855_v26 = vmul.f32 -1.442695, %v565_v22  ;;  %v566_v27 = vadd.f32 %v1239_v47, %v536_v24  ;;  %976 = vpow2.f32 %v858_v21 }
 0x24c   :  { %v545_v29 = vpop.xlane.xlu0 %544  ;;  %v722_v23 = vsub.s32 %v719_v9, %v1259_v48 }
 0x24d   :  { %978 = vrcp.f32 %v622_v25  ;;  %v856_v31 = vmul.f32 -1.442695, %v566_v27  ;;  %v569_v32 = vadd.f32 %v1239_v47, %v545_v29  ;;  %v729_v27 = vsub.s32 %v726_v15, %v1259_v48 }
 0x24e   :  { %v963_v33 = vpop.eup %962  ;;  %980 = vpow2.f32 %v855_v26  ;;  %v740_v29 = vadd.s32 4294967232, %v1254_v38 }
 0x24f   :  { %982 = vpow2.f32 %v856_v31  ;;  %v859_v34 = vmul.f32 -1.442695, %v569_v32  ;;  %v627_v35 = vadd.f32 1.0, %v963_v33  ;;  %v747_v33 = vadd.s32 4294967224, %v1254_v38 }
 0x250   :  { %v548_v36 = vpop.xlane.xlu1 %547  ;;  %v551_v37 = vpop.xlane.xlu0 %550  ;;  %984 = vrcp.f32 %v624_v30 }
 0x251   :  { %v570_v39 = vadd.f32 %v1239_v47, %v548_v36  ;;  %v571_v40 = vadd.f32 %v1239_v47, %v551_v37  ;;  %986 = vpow2.f32 %v859_v34  ;;  %v736_v36 = vsub.s32 %v733_v20, %v1259_v48 }
 0x252   :  { %v965_v41 = vpop.eup %964  ;;  %988 = vrcp.f32 %v627_v35 }
 0x253   :  { %v625_v43 = vadd.f32 1.0, %v965_v41  ;;  %v860_v11 = vmul.f32 -1.442695, %v570_v39  ;;  %v861_v44 = vmul.f32 -1.442695, %v571_v40  ;;  %v967_v45 = vpop.eup %966  ;;  %v754_v39 = vadd.s32 4294967216, %v1254_v38 }
 0x254   :  { %v554_v46 = vpop.xlane.xlu1 %553  ;;  %v969_v13 = vpop.eup %968  ;;  %v628_v54 = vadd.f32 1.0, %v967_v45  ;;  %v761_v41 = vadd.s32 4294967208, %v1254_v38  ;;  %v750_v45 = vsub.s32 %v747_v33, %v1259_v48 }
 0x255   :  { %990 = vrcp.f32 %v625_v43  ;;  %v572_v49 = vadd.f32 %v1239_v47, %v554_v46  ;;  %v971_v50 = vpop.eup %970  ;;  %v626_v52 = vadd.f32 1.0, %v969_v13  ;;  %v768_v46 = vadd.s32 4294967200, %v1254_v38 }
 0x256   :  { %992 = vpow2.f32 %v860_v11  ;;  %v973_v53 = vpop.eup %972  ;;  %v702_v12 = vrot.slane %v971_v50, %v701_v61  ;;  %v757_v50 = vsub.s32 %v754_v39, %v1259_v48 }
 0x257   :  { %994 = vpow2.f32 %v861_v44  ;;  %v862_v55 = vmul.f32 -1.442695, %v572_v49  ;;  %v975_v56 = vpop.eup %974  ;;  %v631_v47 = vadd.f32 1.0, %v973_v53  ;;  %v743_v44 = vsub.s32 %v740_v29, %v1259_v48 }
 0x258   :  { %996 = vrcp.f32 %v626_v52  ;;  %v977_v58 = vpop.eup %976  ;;  %v690_v2 = vrot.slane %v975_v56, %v689_v57  ;;  %v764_v53 = vsub.s32 %v761_v41, %v1259_v48  ;;  %v771_v59 = vsub.s32 %v768_v46, %v1259_v48 }
 0x259   :  { %998 = vpow2.f32 %v862_v55  ;;  %v632_v3 = vadd.f32 1.0, %v977_v58  ;;  %v775_v55 = vadd.s32 4294967192, %v1254_v38 }
 0x25a   :  { %v979_v60 = vpop.eup %978  ;;  %1000 = vrcp.f32 %v628_v54 }
 0x25b   :  { %v981_v62 = vpop.eup %980  ;;  %v695_v63 = vrot.slane %v979_v60, %v694_v18  ;;  %1002 = vrcp.f32 %v631_v47  ;;  %v782_v47 = vadd.s32 4294967184, %v1254_v38 }
 0x25c   :  { %v983_v1 = vpop.eup %982  ;;  %v629_v4 = vadd.f32 1.0, %v981_v62 }
 0x25d   :  { %v630_v6 = vadd.f32 1.0, %v983_v1  ;;  %v985_v7 = vpop.eup %984  ;;  %v697_v8 = vsel %vm696_vm3, %v695_v63, %v690_v2 }
 0x25e   :  { %1004 = vrcp.f32 %v629_v4  ;;  %v987_v10 = vpop.eup %986  ;;  %v704_v19 = vsel %vm703_vm4, %v702_v12, %v697_v8  ;;  %v709_v22 = vrot.slane %v985_v7, %v708_v5  ;;  %v785_v5 = vsub.s32 %v782_v47, %v1259_v48 }
 0x25f   :  { %1006 = vrcp.f32 %v630_v6  ;;  %v633_v16 = vadd.f32 1.0, %v987_v10  ;;  %v989_v17 = vpop.eup %988  ;;  %v792_v8 = vsub.s32 %v789_v0, %v1259_v48 }
 0x260   :  { %1008 = vrcp.f32 %v632_v3  ;;  %v711_v28 = vsel %vm710_vm5, %v709_v22, %v704_v19  ;;  %v730_v43 = vrot.slane %v989_v17, %v729_v27  ;;  %v778_v3 = vsub.s32 %v775_v55, %v1259_v48 }
 0x261   :  { %1010 = vrcp.f32 %v633_v16 }
 0x262   :  { %v991_v21 = vpop.eup %990 }
 0x263   :  { %v993_v24 = vpop.eup %992  ;;  %v716_v25 = vrot.slane %v991_v21, %v715_v14 }
 0x264   :  { %v995_v26 = vpop.eup %994  ;;  %v634_v30 = vadd.f32 1.0, %v993_v24 }
 0x265   :  { %v997_v31 = vpop.eup %996  ;;  %v718_v32 = vsel %vm717_vm6, %v716_v25, %v711_v28  ;;  %v635_v34 = vadd.f32 1.0, %v995_v26 }
 0x266   :  { %v999_v35 = vpop.eup %998  ;;  %v723_v37 = vrot.slane %v997_v31, %v722_v23  ;;  %1012 = vrcp.f32 %v634_v30 }
 0x267   :  { %1014 = vrcp.f32 %v635_v34  ;;  %v636_v40 = vadd.f32 1.0, %v999_v35  ;;  %v1001_v42 = vpop.eup %1000 }
 0x268   :  { %v725_v11 = vsel %vm724_vm7, %v723_v37, %v718_v32  ;;  %v1003_v13 = vpop.eup %1002  ;;  %v737_v52 = vrot.slane %v1001_v42, %v736_v36 }
 0x269   :  { %1016 = vrcp.f32 %v636_v40  ;;  %v732_v49 = vsel %vm731_vm8, %v730_v43, %v725_v11  ;;  %v758_v61 = vrot.slane %v1003_v13, %v757_v50 }
 0x26a   :  { %v739_v58 = vsel %vm738_vm9, %v737_v52, %v732_v49 }
 0x26b   :  { %v1005_v51 = vpop.eup %1004 }
 0x26c   :  { %v1007_v18 = vpop.eup %1006  ;;  %v744_v54 = vrot.slane %v1005_v51, %v743_v44 }
 0x26d   :  { %v1009_v56 = vpop.eup %1008  ;;  %v751_v57 = vrot.slane %v1007_v18, %v750_v45 }
 0x26e   :  { %v746_v60 = vsel %vm745_vm10, %v744_v54, %v739_v58  ;;  %v1011_v62 = vpop.eup %1010  ;;  %v765_v2 = vrot.slane %v1009_v56, %v764_v53 }
 0x26f   :  { %v753_v63 = vsel %vm752_vm11, %v751_v57, %v746_v60  ;;  %v772_v4 = vrot.slane %v1011_v62, %v771_v59 }
 0x270   :  { %v760_v1 = vsel %vm759_vm12, %v758_v61, %v753_v63 }
 0x271   :  { %v767_v6 = vsel %vm766_vm13, %v765_v2, %v760_v1 }
 0x272   :  { %v774_v12 = vsel %vm773_vm14, %v772_v4, %v767_v6 }
 0x273   :  { %v1013_v7 = vpop.eup %1012 }
 0x274   :  { %v1015_v9 = vpop.eup %1014  ;;  %v779_v10 = vrot.slane %v1013_v7, %v778_v3 }
 0x275   :  { %v786_v14 = vrot.slane %v1015_v9, %v785_v5 }
 0x276   :  { %v1017_v38 = vpop.eup %1016  ;;  %v781_v15 = vsel %vm780_vm15, %v779_v10, %v774_v12 }
 0x277   :  { %v793_v16 = vrot.slane %v1017_v38, %v792_v8  ;;  %v788_v17 = vsel %vm787_vm0, %v786_v14, %v781_v15 }
 0x279   :  { %v795_v19 = vsel %vm794_vm1, %v793_v16, %v788_v17 }
 0x27a   :  { %797 = vst [vmem:[#allocation4] sm:$0x1] %v795_v19 }
 0x27b   :  { %1029 = shalt.err (!%p1026_p4)
}
 0x27c   :  { %807 = dma.vmem_to_hbm [thread:$0]  %s805_s7, 16, %s1304_s8, [#allocation5]  }
 0x27d   :  { %1038 = dma.done.wait [#allocation5], 16  }
 0x27e   :  { %1039 = vsyncadd [#allocation5], 4294967280 }
 0x27f   :  { %811 = vsyncpa [#allocation5], 1 }

</bundles_post_ra>
